<compile_context>
chip_gen: v5e
topology: v5e:2x2
jax: 0.10.0
libtpu: 0.0.40
codegen_flags: <defaults>
</compile_context>

<pallas_src>
import functools
import random

import jax
import jax.numpy as jnp
from jax.experimental import pallas as pl
from jax.experimental.pallas import tpu as pltpu


def _argmax_kernel(q_ref, idx_ref):
    """Row-wise argmax over the last (action) axis for one (TB, A) tile.

    Reproduces torch `q_value.max(1).indices`: on ties the first (lowest)
    index of the maximum is returned, deterministically.

    Assumes finite q-values: an all-NaN row would compare false everywhere and
    yield the sentinel `A` instead of torch's NaN-propagating index.
    """
    # Stream the network's native dtype (typically bf16 -> half the HBM bytes
    # of f32) and upcast in-VMEM for the compare/reduce (needed on v5e anyway).
    q = q_ref[...].astype(jnp.float32)                                 # (TB, A)
    tb, a = q.shape
    col = jax.lax.broadcasted_iota(jnp.int32, (tb, a), dimension=1)    # (TB, A)
    row_max = jnp.max(q, axis=1, keepdims=True)                        # (TB, 1)
    cand = jnp.where(q == row_max, col, a)                             # sentinel = A
    # NOTE(perf review): a lane-dense (1, TB) index layout would avoid masked
    # partial stores, but it needs a sublane->lane relayout of the per-row
    # result; the output is <= 1/(A/4+1) of total HBM bytes here, so the
    # robust (TB, 1) column store is kept.
    idx_ref[...] = jnp.min(cand, axis=1, keepdims=True)                # (TB, 1)


def _round_up(x: int, m: int) -> int:
    return (x + m - 1) // m * m


def _choose_tile(batch: int, actions: int, itemsize: int,
                 max_tb: int = 1024, budget_bytes: int = 8 << 20) -> int:
    """Pick the batch tile: biggest sublane-aligned tile (<= max_tb rows) whose
    double-buffered input block stays well inside the v7x VMEM budget (64 MiB
    physical / 32 MiB scoped); the same choice is then also safe on the larger
    v5e/v6e VMEM."""
    sublane = max(8, 32 // itemsize)          # 8 for f32, 16 for bf16, 32 for int8
    tb = min(max_tb, _round_up(max(batch, 1), sublane))
    while tb > sublane and 2 * tb * actions * itemsize > budget_bytes:
        tb //= 2
    return max(sublane, (tb // sublane) * sublane)


@functools.partial(jax.jit, static_argnames=("tb",))
def greedy_actions(q_values: jax.Array, tb: int | None = None) -> jax.Array:
    """Batched greedy-action selection (Pallas TPU kernel).

    q_values: (B, A) float (streamed in its native dtype, e.g. bf16)
    returns:  (B,) int32 row-wise argmax indices (first index on ties).
    """
    if q_values.ndim != 2:
        raise ValueError(f"expected (B, A) q_values, got {q_values.shape}")
    B, A = q_values.shape
    itemsize = q_values.dtype.itemsize
    sublane = max(8, 32 // itemsize)
    if tb is None:
        tb = _choose_tile(B, A, itemsize)
    if tb % sublane:
        raise ValueError(f"tb={tb} must be a multiple of {sublane} for dtype {q_values.dtype}")

    # Sublane-align the batch axis; any partial last grid block is clipped by
    # Pallas, and argmax is row-independent so padded rows are simply discarded.
    Bp = _round_up(B, sublane)
    if Bp != B:
        q_values = jnp.pad(q_values, ((0, Bp - B), (0, 0)))

    out = pl.pallas_call(
        _argmax_kernel,
        out_shape=jax.ShapeDtypeStruct((Bp, 1), jnp.int32),
        # Grid over the batch axis -> BlockSpec auto double-buffering streams
        # (tb, A) tiles from HBM while the previous tile is reduced.
        grid=(pl.cdiv(Bp, tb),),
        in_specs=[pl.BlockSpec((tb, A), lambda i: (i, 0))],
        out_specs=pl.BlockSpec((tb, 1), lambda i: (i, 0)),
        compiler_params=pltpu.CompilerParams(
            # Batch tiles are independent -> shard grid iterations across both
            # v7x TensorCores (harmless no-op on single-core v5e/v6e).
            dimension_semantics=("parallel",),
            # Explicit VMEM budget, safely under the v7x 64 MiB ceiling.
            vmem_limit_bytes=32 * 1024 * 1024,
        ),
    )(q_values)
    return out[:B, 0]


class DQNBase:
    """JAX/Pallas port of the abstract PyTorch DQNBase."""

    def forward(self, x):
        # TODO(synk): DQNBase.forward raises NotImplementedError in the PyTorch
        # source (no layers defined in __init__); subclasses supply the network.
        raise NotImplementedError

    def act(self, state, epsilon, device=None, discrete_action_n=None):
        # Mirrors PyTorch act(): host-side epsilon-greedy branch, then
        # FloatTensor(state).unsqueeze(0) -> forward -> max(1).indices.item().
        # `device` is accepted for signature parity but unused (JAX places arrays).
        if random.random() > epsilon:
            x = jnp.asarray(state, dtype=jnp.float32)[None, ...]   # unsqueeze(0)
            q_value = self.forward(x)                              # (1, A)
            # Perf-review item: at B=1 a pallas_call dispatch + HBM round trip
            # + host sync dwarfs a 1xA argmax, so fuse the argmax into the
            # forward's XLA program; the Pallas kernel (greedy_actions) is
            # reserved for large-batch action selection.
            action = int(jnp.argmax(q_value, axis=1)[0])           # .max(1).indices.item()
        else:
            action = random.randrange(discrete_action_n)
        return action


class _IdentityQHead(DQNBase):
    """Minimal concrete subclass so the base class's act() path is exercisable:
    the 'state' is already the q-value vector (no parameters, deterministic)."""

    def forward(self, x):
        return x


if __name__ == "__main__":
    random.seed(0)
    key = jax.random.PRNGKey(0)

    # Small batch of q-value rows; bf16 input exercises native-dtype streaming.
    B, A = 32, 16
    q = jax.random.normal(key, (B, A), dtype=jnp.float32).astype(jnp.bfloat16)
    ref = jnp.argmax(q.astype(jnp.float32), axis=1)

    # Explicit small tile so the demo exercises a multi-block grid (grid = 2).
    idx = greedy_actions(q, tb=16)
    jax.block_until_ready(idx)
    assert idx.shape == (B,) and idx.dtype == jnp.int32
    assert bool((idx == ref).all()), "argmax mismatch (tiled)"

    # Non-sublane-multiple batch exercises the padding / discard path.
    idx_odd = greedy_actions(q[:10], tb=16)
    jax.block_until_ready(idx_odd)
    assert bool((idx_odd == ref[:10]).all()), "argmax mismatch (padded batch)"

    # Auto tile selection.
    idx_auto = greedy_actions(q)
    jax.block_until_ready(idx_auto)
    assert bool((idx_auto == ref).all()), "argmax mismatch (auto tile)"

    # Full act() path: greedy branch (epsilon=0.0) -- fused XLA argmax at B=1.
    agent = _IdentityQHead()
    state = q[0].astype(jnp.float32)
    action = agent.act(state, epsilon=0.0, device=None, discrete_action_n=A)
    assert action == int(ref[0]), "act() greedy action mismatch"

    # Random branch (epsilon=1.0) -- pure host glue, no kernel involved.
    rand_action = agent.act(state, epsilon=1.0, device=None, discrete_action_n=A)
    assert 0 <= rand_action < A

    print("KERNEL_OK")
</pallas_src>

<mosaic_0001>
module attributes {stable_mosaic.version = 11 : i64} {
  func.func @_argmax_kernel(%arg0: i32, %arg1: memref<16x16xbf16, #tpu.memory_space<vmem>>, %arg2: memref<16x1xi32, #tpu.memory_space<vmem>>) attributes {dimension_semantics = [#tpu.dimension_semantics<parallel>], iteration_bounds = array<i64: 2>, scalar_prefetch = 0 : i64, scratch_operands = 0 : i64, tpu.core_type = #tpu.core_type<tc>, window_params = [{transform_indices = @transform_0, window_bounds = array<i64: 16, 16>}, {transform_indices = @transform_1, window_bounds = array<i64: 16, 1>}]} {
    %c0 = arith.constant 0 : index
    %c0_0 = arith.constant 0 : index
    %0 = vector.load %arg1[%c0, %c0_0] : memref<16x16xbf16, #tpu.memory_space<vmem>>, vector<16x16xbf16>
    %1 = arith.extf %0 : vector<16x16xbf16> to vector<16x16xf32>
    %2 = tpu.iota {dimensions = array<i32: 1>} : vector<16x16xi32>
    %cst = arith.constant dense<0xFF800000> : vector<16xf32>
    %3 = vector.multi_reduction <maximumf>, %1, %cst [1] : vector<16x16xf32> to vector<16xf32>
    %4 = vector.shape_cast %3 : vector<16xf32> to vector<16x1xf32>
    %5 = vector.broadcast %4 : vector<16x1xf32> to vector<16x16xf32>
    %6 = arith.cmpf oeq, %1, %5 : vector<16x16xf32>
    %c16_i32 = arith.constant 16 : i32
    %7 = vector.broadcast %c16_i32 : i32 to vector<16x16xi32>
    %8 = arith.select %6, %2, %7 : vector<16x16xi1>, vector<16x16xi32>
    %cst_1 = arith.constant dense<2147483647> : vector<16xi32>
    %9 = vector.multi_reduction <minsi>, %8, %cst_1 [1] : vector<16x16xi32> to vector<16xi32>
    %10 = vector.shape_cast %9 : vector<16xi32> to vector<16x1xi32>
    %c0_2 = arith.constant 0 : index
    %c0_3 = arith.constant 0 : index
    %11 = vector.load %arg2[%c0_2, %c0_3] : memref<16x1xi32, #tpu.memory_space<vmem>>, vector<16x1xi32>
    tpu.vector_store %arg2[%c0_2, %c0_3], %10 {strides = array<i32>} : memref<16x1xi32, #tpu.memory_space<vmem>>, vector<16x1xi32>,
    return
  }
  func.func @transform_0(%arg0: i32) -> (i32, i32) {
    %c0_i32 = arith.constant 0 : i32
    %c0_i32_0 = arith.constant 0 : i32
    return %arg0, %c0_i32 : i32, i32
  }
  func.func @transform_1(%arg0: i32) -> (i32, i32) {
    %c0_i32 = arith.constant 0 : i32
    %c0_i32_0 = arith.constant 0 : i32
    return %arg0, %c0_i32 : i32, i32
  }
}

</mosaic_0001>

<bundles_post_ra>
// kernel: greedy_actions.1
= control target key start
LH: loop header
LB: loop body
LE: loop exit
PB: predicated region body
PF: predicated region fallthrough
CT: control target
= control target key end

     0   :  { %s267_s6 = smov 0   ;;  %s292_s0 = inlined_call_operand.vmem [shape: bf16[32,16], index: 0, kind: input, shape index: {}]   ;;  %s293_s1 = inlined_call_operand.vmem [shape: s32[32,1], index: 1, kind: output, shape index: {}]  }
   0x1 LB: > { %s226_s7 = sadd.s32 4294967295, %s255_s6   ;;  %p230_p0 = scmp.ge.s32.totalorder %s255_s6, 1  ;;  %s255_s6 = sphi %s267_s6, %s11_s6  }
   0x2   : > { %p88_p1 = scmp.lt.s32.totalorder %s255_s6, 3 }
   0x4   : > { %p89_p2 = pnand %p230_p0, %p88_p1 }
   0x5   : > { %s231_s8 = sshll.u32 (!%p89_p2), %s226_s7, 1 }
   0x6   : > { %92 = sbr.rel (%p89_p2) target bundleno = 388 (0x184), region = 24  ;;  %p109_p3 = scmp.lt.s32.totalorder (!%p89_p2), %s231_s8, 3 }
   0xb   : > { %s295_s8 = smov (!%p109_p3, %s231_s8), 3  ;;  %vm126_vm0 = vcmask 130048   ;;  %v124_v5 = vlaneseq  ;;  %vm167_vm5 = vcmask 7168  }
   0xc   : > { %s232_s9 = sshll.u32 %s295_s8, 2  ;;  %s234_s13 = sshll.u32 %s295_s8, 3 }
   0xd   : > { %s112_s12 = scalar_lea.vmem %s292_s0, %s232_s9  ;;  %v125_v6 = vand.u32 127, %v124_v5  ;;  %s118_s16 = scalar_lea.vmem %s293_s1, %s234_s13 }
   0xe   : > { %v238_v0 = vld [vmem:[%s112_s12] sm:$0xff]  }
   0xf   : > { %v239_v1 = vunpack.c.l.bf16 %v238_v0  ;;  %v240_v3 = vunpack.c.h.bf16 %v238_v0 }
  0x11   : > { %v127_v2 = vsel %vm126_vm0, %v239_v1, -inf  ;;  %v130_v4 = vsel %vm126_vm0, %v240_v3, -inf }
  0x12   : > { %128 = vmax.xlane.f32.xlu0 %v127_v2 }
  0x1a   : > { %131 = vmax.xlane.f32.xlu0 %v130_v4 }
  0x85   : > { %v129_v7 = vpop.xlane.xlu0 %128 }
  0x86   : > { %vm133_vm1 = vcmp.eq.f32.partialorder %v239_v1, %v129_v7 }
  0x87   : > { %v135_v8 = vsel %vm133_vm1, %v125_v6, 16 }
  0x88   : > { %v137_v9 = vsel %vm126_vm0, %v135_v8, 2147483647 }
  0x89   : > { %v139_v10 = vshra.s32 %v137_v9, 16  ;;  %v138_v17 = vand.u32 65535, %v137_v9 }
  0x8b   : > { %v141_v11 = vcvt.s32.f32 %v139_v10  ;;  %v140_v19 = vcvt.s32.f32 %v138_v17 }
  0x8d   : > { %142 = vmin.xlane.f32.xlu1 %v141_v11  ;;  %v132_v12 = vpop.xlane.xlu0 %131 }
  0x8e   : > { %vm134_vm2 = vcmp.eq.f32.partialorder %v240_v3, %v132_v12 }
  0x8f   : > { %v136_v13 = vsel %vm134_vm2, %v125_v6, 16 }
  0x90   : > { %v152_v14 = vsel %vm126_vm0, %v136_v13, 2147483647 }
  0x91   : > { %v154_v15 = vshra.s32 %v152_v14, 16  ;;  %v153_v21 = vand.u32 65535, %v152_v14 }
  0x93   : > { %v156_v16 = vcvt.s32.f32 %v154_v15  ;;  %v155_v23 = vcvt.s32.f32 %v153_v21 }
  0x95   : > { %157 = vmin.xlane.f32.xlu1 %v156_v16 }
 0x100   : > { %v143_v18 = vpop.xlane.xlu1 %142 }
 0x101   : > { %vm144_vm3 = vcmp.eq.f32.partialorder %v141_v11, %v143_v18  ;;  %v149_v25 = vcvt.f32.s32 %v143_v18 }
 0x102   : > { %v145_v20 = vsel %vm144_vm3, %v140_v19, inf }
 0x103   : > { %146 = vmin.xlane.f32.xlu2 %v145_v20  ;;  %v150_v27 = vshll.u32 %v149_v25, 16 }
 0x108   : > { %v158_v22 = vpop.xlane.xlu1 %157 }
 0x109   : > { %vm159_vm4 = vcmp.eq.f32.partialorder %v156_v16, %v158_v22  ;;  %v164_v30 = vcvt.f32.s32 %v158_v22 }
 0x10a   : > { %v160_v24 = vsel %vm159_vm4, %v155_v23, inf }
 0x10b   : > { %161 = vmin.xlane.f32.xlu2 %v160_v24  ;;  %v165_v32 = vshll.u32 %v164_v30, 16 }
 0x176   : > { %v147_v26 = vpop.xlane.xlu2 %146 }
 0x177   : > { %v148_v28 = vcvt.f32.s32 %v147_v26 }
 0x179   : > { %v151_v29 = vadd.s32 %v150_v27, %v148_v28 }
 0x17b   : > { %168 = vst.msk [vmem:[%s118_s16] sm:$0xff] %vm167_vm5, %v151_v29 }
 0x17e   : > { %v162_v31 = vpop.xlane.xlu2 %161 }
 0x17f   : > { %v163_v33 = vcvt.f32.s32 %v162_v31 }
 0x181   : > { %v166_v34 = vadd.s32 %v165_v32, %v163_v33 }
 0x183   : > { %169 = vst.msk [vmem:[%s118_s16 + $0x8] sm:$0xff] %vm167_vm5, %v166_v34 }
 0x184 PF: > { %s11_s6 = sadd.s32 1, %s255_s6  }
 0x185   : > { %p8_p4 = scmp.ge.s32.totalorder %s11_s6, 4  }
 0x187   :  { %10 = sbr.rel (!%p8_p4) target bundleno = 1 (0x1), region = 54 }

</bundles_post_ra>
